<compile_context>
chip_gen: v6e
topology: v6e:2x2x1
jax: 0.10.0
libtpu: 0.0.40
codegen_flags: <defaults>
</compile_context>

<pallas_src>
import functools

import jax
import jax.numpy as jnp
from jax.experimental import pallas as pl
from jax.experimental.pallas import tpu as pltpu


def _ce_partial_kernel(x_ref, t_ref, ce_out_ref, cnt_out_ref,
                       acc_ce_ref, acc_cnt_ref, *, ignore_index):
    """Per-batch-row cross-entropy partial sums over lane-dense spatial tiles.

    x_ref:   (1, C, T)   logits tile (any float dtype, upcast to f32)
    t_ref:   (1, 1, T)   int32 target tile
    outputs: (1, 1, 1)   per-batch CE sum and valid-pixel count
    scratch: (1, 1, T)   lane-wise partial-sum accumulators (f32)
    """
    j = pl.program_id(1)

    @pl.when(j == 0)
    def _():
        acc_ce_ref[...] = jnp.zeros_like(acc_ce_ref)
        acc_cnt_ref[...] = jnp.zeros_like(acc_cnt_ref)

    x = x_ref[...].astype(jnp.float32)          # (1, C, T)
    t = t_ref[...]                              # (1, 1, T) int32

    # Numerically stable log-sum-exp over the class (sublane) axis.
    m = jnp.max(x, axis=1, keepdims=True)                                 # (1,1,T)
    lse = m + jnp.log(jnp.sum(jnp.exp(x - m), axis=1, keepdims=True))     # (1,1,T)

    # Gather the target-class logit via a one-hot compare (no real gather).
    cls = jax.lax.broadcasted_iota(jnp.int32, x.shape, 1)                 # (1,C,T)
    picked = jnp.sum(jnp.where(cls == t, x, 0.0), axis=1, keepdims=True)  # (1,1,T)

    # ignore_index handling (matches F.cross_entropy default ignore_index=-100).
    # TODO(synk): labels >= C that are not ignore_index are undefined behavior
    # in PyTorch (device assert); here they silently contribute `lse`.
    valid = t != ignore_index                                             # (1,1,T)
    ce = jnp.where(valid, lse - picked, 0.0)                              # (1,1,T)

    acc_ce_ref[...] += ce                           # pure VPU lane-wise adds
    acc_cnt_ref[...] += valid.astype(jnp.float32)

    @pl.when(j == pl.num_programs(1) - 1)
    def _():
        ce_out_ref[...] = jnp.sum(acc_ce_ref[...]).reshape(1, 1, 1)
        cnt_out_ref[...] = jnp.sum(acc_cnt_ref[...]).reshape(1, 1, 1)


def _choose_tile_hw(hw, cap):
    """Largest multiple-of-128 divisor of hw that is <= cap; else hw itself.

    If no such divisor exists we fall back to the full spatial axis (legal for
    BlockSpec since it equals the full array dim).
    """
    best = None
    for t in range(128, min(hw, cap) + 1, 128):
        if hw % t == 0:
            best = t
    return best if best is not None else hw


def focal_loss_2d(logits_nchw, target_nhw, *, gamma=2.0, weight=None,
                  size_average=True, ignore_index=-100, max_tile_lanes=32768):
    """Focal loss on (N, C, H, W) logits / (N, H, W) integer targets."""
    N, C, H, W = logits_nchw.shape
    HW = H * W

    # Pure views, no transpose / HBM copy before the kernel.
    x = logits_nchw.reshape(N, C, HW)
    t = target_nhw.reshape(N, 1, HW).astype(jnp.int32)

    # Lane-dense spatial tile. Cap keeps the double-buffered logits block
    # (C * T_HW * 4 bytes * 2) comfortably inside v7x's 64 MiB VMEM while
    # staying in the >85%-of-HBM-roofline tile-size regime.
    t_hw = _choose_tile_hw(HW, max_tile_lanes)
    n_inner = HW // t_hw

    kernel = functools.partial(_ce_partial_kernel, ignore_index=ignore_index)

    ce_part, cnt_part = pl.pallas_call(
        kernel,
        out_shape=(jax.ShapeDtypeStruct((N, 1, 1), jnp.float32),
                   jax.ShapeDtypeStruct((N, 1, 1), jnp.float32)),
        grid_spec=pltpu.PrefetchScalarGridSpec(
            num_scalar_prefetch=0,
            grid=(N, n_inner),
            in_specs=[
                pl.BlockSpec((1, C, t_hw), lambda n, j: (n, 0, j)),
                pl.BlockSpec((1, 1, t_hw), lambda n, j: (n, 0, j)),
            ],
            out_specs=[
                pl.BlockSpec((1, 1, 1), lambda n, j: (n, 0, 0)),
                pl.BlockSpec((1, 1, 1), lambda n, j: (n, 0, 0)),
            ],
            scratch_shapes=[
                pltpu.VMEM((1, 1, t_hw), jnp.float32),
                pltpu.VMEM((1, 1, t_hw), jnp.float32),
            ],
        ),
        compiler_params=pltpu.CompilerParams(
            dimension_semantics=("parallel", "arbitrary")),
    )(x, t)

    total_ce = jnp.sum(ce_part)
    total_cnt = jnp.sum(cnt_part)
    mean_ce = total_ce / total_cnt          # F.cross_entropy 'mean' reduction

    # `weight` intentionally unused: the reference module builds Variable(weight)
    # but never passes it to F.cross_entropy.
    del weight

    logpt = -mean_ce
    pt = jnp.exp(logpt)
    loss = -((1.0 - pt) ** gamma) * logpt
    # size_average=True -> loss.mean(); loss is scalar so mean == sum == loss.
    return loss


if __name__ == "__main__":
    key = jax.random.PRNGKey(0)
    k1, k2 = jax.random.split(key)

    N, C, H, W = 2, 4, 16, 16
    logits = jax.random.normal(k1, (N, C, H, W), dtype=jnp.float32)
    target = jax.random.randint(k2, (N, H, W), 0, C, dtype=jnp.int32)

    # Deterministic "class weights" (shape (C,)), unused in the forward math,
    # exactly like the reference module.
    class_weight = jnp.ones((C,), dtype=jnp.float32)

    loss = focal_loss_2d(logits, target, gamma=2.0, weight=class_weight,
                         size_average=True)
    jax.block_until_ready(loss)

    # Pure-JAX reference check.
    xr = jnp.transpose(logits, (0, 2, 3, 1)).reshape(-1, C)
    tr = target.reshape(-1)
    lse = jax.scipy.special.logsumexp(xr, axis=-1)
    ce = jnp.mean(lse - xr[jnp.arange(xr.shape[0]), tr])
    logpt_ref = -ce
    pt_ref = jnp.exp(logpt_ref)
    ref = -((1.0 - pt_ref) ** 2.0) * logpt_ref
    assert jnp.allclose(loss, ref, rtol=1e-5, atol=1e-6), (loss, ref)

    print("KERNEL_OK")
</pallas_src>

<mosaic_0001>
module attributes {stable_mosaic.version = 11 : i64} {
  func.func @_ce_partial_kernel(%arg0: i32, %arg1: i32, %arg2: memref<1x4x256xf32, #tpu.memory_space<vmem>>, %arg3: memref<1x1x256xi32, #tpu.memory_space<vmem>>, %arg4: memref<1x1x1xf32, #tpu.memory_space<vmem>>, %arg5: memref<1x1x1xf32, #tpu.memory_space<vmem>>, %arg6: memref<1x1x256xf32, #tpu.memory_space<vmem>>, %arg7: memref<1x1x256xf32, #tpu.memory_space<vmem>>) attributes {dimension_semantics = [#tpu.dimension_semantics<parallel>, #tpu.dimension_semantics<arbitrary>], iteration_bounds = array<i64: 2, 1>, scalar_prefetch = 0 : i64, scratch_operands = 2 : i64, tpu.core_type = #tpu.core_type<tc>, window_params = [{transform_indices = @transform_0, window_bounds = array<i64: 1, 4, 256>}, {transform_indices = @transform_1, window_bounds = array<i64: 1, 1, 256>}, {transform_indices = @transform_2, window_bounds = array<i64: 1, 1, 1>}, {transform_indices = @transform_3, window_bounds = array<i64: 1, 1, 1>}]} {
    %c0_i32 = arith.constant 0 : i32
    %0 = arith.cmpi eq, %arg1, %c0_i32 : i32
    %1 = arith.extui %0 : i1 to i32
    %c0_i32_0 = arith.constant 0 : i32
    %2 = arith.cmpi ne, %1, %c0_i32_0 : i32
    scf.if %2 {
      %cst_24 = arith.constant 0.000000e+00 : f32
      %37 = vector.broadcast %cst_24 : f32 to vector<1x1x256xf32>
      %c0_25 = arith.constant 0 : index
      %c0_26 = arith.constant 0 : index
      %c0_27 = arith.constant 0 : index
      %38 = vector.load %arg6[%c0_25, %c0_26, %c0_27] : memref<1x1x256xf32, #tpu.memory_space<vmem>>, vector<1x1x256xf32>
      tpu.vector_store %arg6[%c0_25, %c0_26, %c0_27], %37 {strides = array<i32>} : memref<1x1x256xf32, #tpu.memory_space<vmem>>, vector<1x1x256xf32>,
      %cst_28 = arith.constant 0.000000e+00 : f32
      %39 = vector.broadcast %cst_28 : f32 to vector<1x1x256xf32>
      %c0_29 = arith.constant 0 : index
      %c0_30 = arith.constant 0 : index
      %c0_31 = arith.constant 0 : index
      %40 = vector.load %arg7[%c0_29, %c0_30, %c0_31] : memref<1x1x256xf32, #tpu.memory_space<vmem>>, vector<1x1x256xf32>
      tpu.vector_store %arg7[%c0_29, %c0_30, %c0_31], %39 {strides = array<i32>} : memref<1x1x256xf32, #tpu.memory_space<vmem>>, vector<1x1x256xf32>,
    } else {
    }
    %c0 = arith.constant 0 : index
    %c0_1 = arith.constant 0 : index
    %c0_2 = arith.constant 0 : index
    %3 = vector.load %arg2[%c0, %c0_1, %c0_2] : memref<1x4x256xf32, #tpu.memory_space<vmem>>, vector<1x4x256xf32>
    %c0_3 = arith.constant 0 : index
    %c0_4 = arith.constant 0 : index
    %c0_5 = arith.constant 0 : index
    %4 = vector.load %arg3[%c0_3, %c0_4, %c0_5] : memref<1x1x256xi32, #tpu.memory_space<vmem>>, vector<1x1x256xi32>
    %cst = arith.constant dense<0xFF800000> : vector<1x256xf32>
    %5 = vector.multi_reduction <maximumf>, %3, %cst [1] : vector<1x4x256xf32> to vector<1x256xf32>
    %6 = vector.shape_cast %5 : vector<1x256xf32> to vector<1x1x256xf32>
    %7 = vector.broadcast %6 : vector<1x1x256xf32> to vector<1x4x256xf32>
    %8 = arith.subf %3, %7 : vector<1x4x256xf32>
    %9 = math.exp %8 : vector<1x4x256xf32>
    %cst_6 = arith.constant dense<0.000000e+00> : vector<1x256xf32>
    %10 = vector.multi_reduction <add>, %9, %cst_6 [1] : vector<1x4x256xf32> to vector<1x256xf32>
    %11 = vector.shape_cast %10 : vector<1x256xf32> to vector<1x1x256xf32>
    %12 = math.log %11 : vector<1x1x256xf32>
    %13 = arith.addf %6, %12 : vector<1x1x256xf32>
    %14 = tpu.iota {dimensions = array<i32: 1>} : vector<1x4x256xi32>
    %15 = vector.broadcast %4 : vector<1x1x256xi32> to vector<1x4x256xi32>
    %16 = arith.cmpi eq, %14, %15 : vector<1x4x256xi32>
    %cst_7 = arith.constant 0.000000e+00 : f32
    %17 = vector.broadcast %cst_7 : f32 to vector<1x4x256xf32>
    %18 = arith.select %16, %3, %17 : vector<1x4x256xi1>, vector<1x4x256xf32>
    %cst_8 = arith.constant dense<0.000000e+00> : vector<1x256xf32>
    %19 = vector.multi_reduction <add>, %18, %cst_8 [1] : vector<1x4x256xf32> to vector<1x256xf32>
    %20 = vector.shape_cast %19 : vector<1x256xf32> to vector<1x1x256xf32>
    %c-100_i32 = arith.constant -100 : i32
    %21 = vector.broadcast %c-100_i32 : i32 to vector<1x1x256xi32>
    %22 = arith.cmpi ne, %4, %21 : vector<1x1x256xi32>
    %23 = arith.subf %13, %20 : vector<1x1x256xf32>
    %cst_9 = arith.constant 0.000000e+00 : f32
    %24 = vector.broadcast %cst_9 : f32 to vector<1x1x256xf32>
    %25 = arith.select %22, %23, %24 : vector<1x1x256xi1>, vector<1x1x256xf32>
    %c0_10 = arith.constant 0 : index
    %c0_11 = arith.constant 0 : index
    %c0_12 = arith.constant 0 : index
    %26 = vector.load %arg6[%c0_10, %c0_11, %c0_12] : memref<1x1x256xf32, #tpu.memory_space<vmem>>, vector<1x1x256xf32>
    %27 = arith.addf %26, %25 : vector<1x1x256xf32>
    %c0_13 = arith.constant 0 : index
    %c0_14 = arith.constant 0 : index
    %c0_15 = arith.constant 0 : index
    %28 = vector.load %arg6[%c0_13, %c0_14, %c0_15] : memref<1x1x256xf32, #tpu.memory_space<vmem>>, vector<1x1x256xf32>
    tpu.vector_store %arg6[%c0_13, %c0_14, %c0_15], %27 {strides = array<i32>} : memref<1x1x256xf32, #tpu.memory_space<vmem>>, vector<1x1x256xf32>,
    %c0_16 = arith.constant 0 : index
    %c0_17 = arith.constant 0 : index
    %c0_18 = arith.constant 0 : index
    %29 = vector.load %arg7[%c0_16, %c0_17, %c0_18] : memref<1x1x256xf32, #tpu.memory_space<vmem>>, vector<1x1x256xf32>
    %30 = arith.extui %22 : vector<1x1x256xi1> to vector<1x1x256xi32>
    %31 = arith.sitofp %30 : vector<1x1x256xi32> to vector<1x1x256xf32>
    %32 = arith.addf %29, %31 : vector<1x1x256xf32>
    %c0_19 = arith.constant 0 : index
    %c0_20 = arith.constant 0 : index
    %c0_21 = arith.constant 0 : index
    %33 = vector.load %arg7[%c0_19, %c0_20, %c0_21] : memref<1x1x256xf32, #tpu.memory_space<vmem>>, vector<1x1x256xf32>
    tpu.vector_store %arg7[%c0_19, %c0_20, %c0_21], %32 {strides = array<i32>} : memref<1x1x256xf32, #tpu.memory_space<vmem>>, vector<1x1x256xf32>,
    %c0_i32_22 = arith.constant 0 : i32
    %34 = arith.cmpi eq, %arg1, %c0_i32_22 : i32
    %35 = arith.extui %34 : i1 to i32
    %c0_i32_23 = arith.constant 0 : i32
    %36 = arith.cmpi ne, %35, %c0_i32_23 : i32
    scf.if %36 {
      %c0_24 = arith.constant 0 : index
      %c0_25 = arith.constant 0 : index
      %c0_26 = arith.constant 0 : index
      %37 = vector.load %arg6[%c0_24, %c0_25, %c0_26] : memref<1x1x256xf32, #tpu.memory_space<vmem>>, vector<1x1x256xf32>
      %38 = vector.shape_cast %37 : vector<1x1x256xf32> to vector<1x1x1x256xf32>
      %cst_27 = arith.constant dense<0.000000e+00> : vector<1xf32>
      %39 = vector.multi_reduction <add>, %38, %cst_27 [1, 2, 3] : vector<1x1x1x256xf32> to vector<1xf32>
      %40 = vector.shape_cast %39 : vector<1xf32> to vector<1x1x1x1xf32>
      %41 = vector.extract %40[0, 0, 0, 0] : f32 from vector<1x1x1x1xf32>
      %42 = vector.broadcast %41 : f32 to vector<1x1x1xf32>
      %c0_28 = arith.constant 0 : index
      %c0_29 = arith.constant 0 : index
      %c0_30 = arith.constant 0 : index
      %43 = vector.load %arg4[%c0_28, %c0_29, %c0_30] : memref<1x1x1xf32, #tpu.memory_space<vmem>>, vector<1x1x1xf32>
      tpu.vector_store %arg4[%c0_28, %c0_29, %c0_30], %42 {strides = array<i32>} : memref<1x1x1xf32, #tpu.memory_space<vmem>>, vector<1x1x1xf32>,
      %c0_31 = arith.constant 0 : index
      %c0_32 = arith.constant 0 : index
      %c0_33 = arith.constant 0 : index
      %44 = vector.load %arg7[%c0_31, %c0_32, %c0_33] : memref<1x1x256xf32, #tpu.memory_space<vmem>>, vector<1x1x256xf32>
      %45 = vector.shape_cast %44 : vector<1x1x256xf32> to vector<1x1x1x256xf32>
      %cst_34 = arith.constant dense<0.000000e+00> : vector<1xf32>
      %46 = vector.multi_reduction <add>, %45, %cst_34 [1, 2, 3] : vector<1x1x1x256xf32> to vector<1xf32>
      %47 = vector.shape_cast %46 : vector<1xf32> to vector<1x1x1x1xf32>
      %48 = vector.extract %47[0, 0, 0, 0] : f32 from vector<1x1x1x1xf32>
      %49 = vector.broadcast %48 : f32 to vector<1x1x1xf32>
      %c0_35 = arith.constant 0 : index
      %c0_36 = arith.constant 0 : index
      %c0_37 = arith.constant 0 : index
      %50 = vector.load %arg5[%c0_35, %c0_36, %c0_37] : memref<1x1x1xf32, #tpu.memory_space<vmem>>, vector<1x1x1xf32>
      tpu.vector_store %arg5[%c0_35, %c0_36, %c0_37], %49 {strides = array<i32>} : memref<1x1x1xf32, #tpu.memory_space<vmem>>, vector<1x1x1xf32>,
    } else {
    }
    return
  }
  func.func @transform_0(%arg0: i32, %arg1: i32) -> (i32, i32, i32) {
    %c0_i32 = arith.constant 0 : i32
    %c0_i32_0 = arith.constant 0 : i32
    return %arg0, %c0_i32, %arg1 : i32, i32, i32
  }
  func.func @transform_1(%arg0: i32, %arg1: i32) -> (i32, i32, i32) {
    %c0_i32 = arith.constant 0 : i32
    %c0_i32_0 = arith.constant 0 : i32
    return %arg0, %c0_i32, %arg1 : i32, i32, i32
  }
  func.func @transform_2(%arg0: i32, %arg1: i32) -> (i32, i32, i32) {
    %c0_i32 = arith.constant 0 : i32
    %c0_i32_0 = arith.constant 0 : i32
    %c0_i32_1 = arith.constant 0 : i32
    return %arg0, %c0_i32, %c0_i32_0 : i32, i32, i32
  }
  func.func @transform_3(%arg0: i32, %arg1: i32) -> (i32, i32, i32) {
    %c0_i32 = arith.constant 0 : i32
    %c0_i32_0 = arith.constant 0 : i32
    %c0_i32_1 = arith.constant 0 : i32
    return %arg0, %c0_i32, %c0_i32_0 : i32, i32, i32
  }
}

</mosaic_0001>

<bundles_post_ra>
// kernel: tpu_custom_call.1
= control target key start
LH: loop header
LB: loop body
LE: loop exit
PB: predicated region body
PF: predicated region fallthrough
CT: control target
= control target key end

     0   :  { %9 = vsyncpa [#allocation5], 0  ;;  %s949_s0 = inlined_call_operand.hbm [shape: f32[2,4,256], index: 0, kind: input, shape index: {}]   ;;  %s950_s1 = inlined_call_operand.hbm [shape: s32[2,1,256], index: 1, kind: input, shape index: {}]   ;;  %s951_s2 = inlined_call_operand.vmem [shape: f32[2,1,1], index: 2, kind: output, shape index: {0}]   ;;  %s952_s3 = inlined_call_operand.vmem [shape: f32[2,1,1], index: 3, kind: output, shape index: {1}]  }
   0x1   :  { %11 = vsyncpa [#allocation5 + $0x1], 0 }
   0x2   :  { %12 = vsyncpa [#allocation7], 0 }
   0x3   :  { %14 = vsyncpa [#allocation7 + $0x1], 0  ;;  %s781_s12 = smov 0   ;;  %s783_s13 = smov 0  }
   0x4   :  { %s785_s14 = smov 0   ;;  %s787_s15 = smov 0  }
   0x5   :  { %s789_s16 = smov 0   ;;  %s791_s17 = smov 0  }
   0x6 LB: > { %s554_s18 = sadd.s32 4294967295, %s755_s17   ;;  %s32_s19 = sadd.s32 1, %s751_s16  ;;  %s755_s17 = sphi %s791_s17, %s20_s17   ;;  %s751_s16 = sphi %s789_s16, %s963_s16   ;;  %s747_s15 = sphi %s787_s15, %s962_s15   ;;  %s743_s14 = sphi %s785_s14, %s961_s14   ;;  %s739_s13 = sphi %s783_s13, %s960_s13   ;;  %s735_s12 = sphi %s781_s12, %s959_s12  }
   0x7   : > { %p34_p0 = scmp.ge.s32.totalorder %s32_s19, 2  ;;  %s41_s20 = sadd.s32 1, %s743_s14 }
   0x8   : > { %p48_p1 = scmp.ne.s32.totalorder %s743_s14, %s739_s13  ;;  %p49_p2 = scmp.eq.s32.totalorder %s755_s17, 0 }
   0x9   : > { %s965_s19 = smov (%p34_p0, %s32_s19), 0  ;;  %p54_p4 = scmp.ne.s32.totalorder %s739_s13, %s735_s12 }
   0xa   : > { %p817_p3 = por %p49_p2, %p48_p1  ;;  %s36_s22 = ssub.s32 %s751_s16, %s965_s19 }
   0xb   : > { %p55_p5 = scmp.eq.s32.totalorder %s554_s18, 0  ;;  %p39_p6 = scmp.eq.s32.totalorder %s36_s22, 0 }
   0xc   : > { %p587_p8 = scmp.lt.s32.totalorder %s755_s17, 2  ;;  %s833_s25 = sand.u32 1, %s743_s14  }
   0xd   : > { %p824_p7 = por %p55_p5, %p54_p4  ;;  %s570_s26 = sshll.u32 %s751_s16, 7 }
   0xe   : > { %s830_s24 = scalar_select %p39_p6, %s743_s14, %s41_s20  }
   0xf   : > { %s558_s27 = sshll.u32 %s833_s25, 3  ;;  %s170_s30 = scalar_lea.hbm %s949_s0, %s570_s26 }
  0x10   : > { %s162_s4 = scalar_lea.vmem [#allocation4], %s558_s27  ;;  %p842_p9 = pnand %p587_p8, %p817_p3 }
  0x11   : > { %s172_s5 = sshll.u32 %s162_s4, 4  ;;  %p564_p10 = scmp.ge.s32.totalorder %s755_s17, 1  ;;  %s173_s5 = int_to_ptr.vmem [resolvable:$true] %s172_s5 }
  0x12   : > { %p198_p11 = scmp.lt.s32.totalorder %s755_s17, 3  ;;  %s159_s7 = scalar_lea.sflag [#allocation5], %s833_s25 }
  0x13   : > { %p647_p12 = pneg %p842_p9  ;;  %s658_s8 = scalar_lea.vmem %s173_s5, 128 }
  0x14   : > { %p659_p13 = scmp.ne.s32.totalorder %s173_s5, %s658_s8  ;;  %s757_s9 = smov [#allocation4]  }
  0x15   : > { %s663_s10 = sshll.u32 %s757_s9, 4  ;;  %s664_s10 = int_to_ptr.vmem [resolvable:$false] %s663_s10 }
  0x16   : > { %p661_p0 = pnand %p659_p13, %p647_p12  ;;  %s665_s11 = scalar_lea.vmem %s664_s10, 256 }
  0x17   : > { %p666_p2 = scmp.lt.s32.totalorder %s173_s5, %s664_s10  ;;  %p667_p3 = scmp.lt.s32.totalorder %s665_s11, %s658_s8 }
  0x18   : > { %p662_p1 = pneg %p661_p0 }
  0x19   : > { %p668_p4 = por %p667_p3, %p666_p2 }
  0x1b   : > { %p669_p5 = pnand %p668_p4, %p662_p1 }
  0x1d   : > { %672 = shalt.err (!%p669_p5)
}
  0x1e   : > { %583 = dma.hbm_to_vmem [thread:$0]  (!%p842_p9), %s170_s30, 128, %s173_s5, %s159_s7  }
  0x1f   : > { %p860_p6 = pnand %p564_p10, %p198_p11  ;;  %s561_s18 = sshll.u32 %s833_s25, 1 }
  0x20   : > { %s571_s20 = sshll.u32 %s751_s16, 5  ;;  %s183_s27 = scalar_lea.vmem [#allocation6], %s561_s18 }
  0x21   : > { %s191_s26 = scalar_lea.hbm %s950_s1, %s571_s20  ;;  %s193_s28 = sshll.u32 %s183_s27, 4  ;;  %s194_s28 = int_to_ptr.vmem [resolvable:$true] %s193_s28 }
  0x22   : > { %s180_s29 = scalar_lea.sflag [#allocation7], %s833_s25  ;;  %s686_s4 = scalar_lea.vmem %s194_s28, 32 }
  0x23   : > { %p687_p8 = scmp.ne.s32.totalorder %s194_s28, %s686_s4  ;;  %s758_s30 = smov [#allocation6]  }
  0x24   : > { %s691_s5 = sshll.u32 %s758_s30, 4  ;;  %s692_s5 = int_to_ptr.vmem [resolvable:$false] %s691_s5 }
  0x25   : > { %p689_p13 = pnand %p687_p8, %p647_p12  ;;  %s693_s7 = scalar_lea.vmem %s692_s5, 64 }
  0x26   : > { %p694_p10 = scmp.lt.s32.totalorder %s194_s28, %s692_s5  ;;  %p695_p11 = scmp.lt.s32.totalorder %s693_s7, %s686_s4 }
  0x27   : > { %p690_p0 = pneg %p689_p13 }
  0x28   : > { %p696_p1 = por %p695_p11, %p694_p10 }
  0x2a   : > { %p697_p2 = pnand %p696_p1, %p690_p0 }
  0x2c   : > { %700 = shalt.err (!%p697_p2)
}
  0x2d   : > { %586 = dma.hbm_to_vmem [thread:$0]  (!%p842_p9), %s191_s26, 32, %s194_s28, %s180_s29  }
  0x2e   : > { %202 = sbr.rel (%p860_p6) target bundleno = 354 (0x162), region = 28  ;;  %s204_s25 = sand.u32 (!%p860_p6), 1, %s739_s13  }
  0x2f   : > { %s565_s8 = sshll.u32 (!%p860_p6), %s204_s25, 3  ;;  %s205_s9 = scalar_lea.sflag (!%p860_p6), [#allocation5], %s204_s25 }
  0x30   : > { %s208_s10 = scalar_lea.vmem (!%p860_p6), [#allocation4], %s565_s8 }
  0x33   : > { %726 = dma.done.wait (%p824_p7), %s205_s9, 128  }
  0x34   : > { %728 = vsyncadd (%p824_p7), %s205_s9, 4294967168  ;;  %s566_s11 = sshll.u32 %s204_s25, 1  ;;  %s214_s18 = scalar_lea.sflag [#allocation7], %s204_s25 }
  0x35   : > { %s217_s20 = scalar_lea.vmem [#allocation6], %s566_s11 }
  0x36   : > { %730 = dma.done.wait (%p824_p7), %s214_s18, 32  }
  0x37   : > { %732 = vsyncadd (%p824_p7), %s214_s18, 4294967264  ;;  %v258_v0 = vlaneseq  ;;  %v759_v2 = vmov 0.0   ;;  %vm269_vm1 = vcmask 1043456   ;;  %v264_v3 = vld [vmem:[%s208_s10] sm:$0xff]  ;;  %v894_v4 = vld [vmem:[%s217_s20] sm:$0x3] }
  0x38   : > { %v267_v5 = vcombine.high %v264_v3, %v264_v3  ;;  %v270_v6 = vsel %vm269_vm1, %v264_v3, -inf  ;;  %vm342_vm2 = vcmp.ne.s32.totalorder %v894_v4, 4294967196  ;;  %v760_v61 = vmov 1966171168   ;;  %p248_p7 = scmp.lt.s32.totalorder %s747_s15, 1 }
  0x39   : > { %vm886_vm0 = vcmp.lt.s32.totalorder %v258_v0, 256  ;;  %v271_v7 = vrot.slane %v270_v6, 4  ;;  %v567_v10 = vsel %vm342_vm2, 1.0, %v759_v2  ;;  %v315_v26 = vshrl.u32 %v258_v0, 7 }
  0x3a   : > { %262 = vst.msk [vmem:[#allocation2] sm:$0x3] %vm886_vm0, %v759_v2  ;;  %263 = vst.msk [vmem:[#allocation3] sm:$0x3] %vm886_vm0, %v759_v2  ;;  %v277_v8 = vsel %vm269_vm1, %v267_v5, -inf  ;;  %v349_v62 = vunpack.c.l.s4 %v760_v61  ;;  %vm391_vm5 = vcmask 1040384  }
  0x3b   : > { %v272_v11 = vmax.f32 %v270_v6, %v271_v7  ;;  %v278_v12 = vrot.slane %v277_v8, 4  ;;  %v903_v27 = vsub.s32 0, %v315_v26  ;;  %v905_v28 = vsub.s32 1, %v315_v26  ;;  %s967_s15 = smov (!%p248_p7, %s747_s15), 1 }
  0x3c   : > { %s250_s12 = scalar_lea.vmem %s951_s2, %s967_s15  ;;  %vm405_vm6 = vcmask 0   ;;  %s253_s27 = scalar_lea.vmem %s952_s3, %s967_s15 }
  0x3d   : > { %v273_v14 = vrot.slane %v272_v11, 2  ;;  %v279_v15 = vmax.f32 %v277_v8, %v278_v12  ;;  %v319_v29 = vrot.slane %v894_v4, %v903_v27  ;;  %v323_v30 = vrot.slane %v894_v4, %v905_v28 }
  0x3e   : > { %v350_v8 = vunpack.c.0.s8 %v349_v62 }
  0x3f   : > { %v274_v16 = vmax.f32 %v272_v11, %v273_v14  ;;  %v280_v17 = vrot.slane %v279_v15, 2  ;;  %vm324_vm3 = vcmp.eq.s32.totalorder %v315_v26, %v319_v29  ;;  %vm325_vm4 = vcmp.eq.s32.totalorder %v315_v26, %v323_v30 }
  0x40   : > { %v326_v35 = vsel %vm324_vm3, %v264_v3, 0.0  ;;  %v327_v39 = vsel %vm325_vm4, %v267_v5, 0.0  ;;  %v353_v12 = vsub.s32 %v350_v8, %v315_v26 }
  0x41   : > { %v371_v9 = vld [vmem:[#allocation3] sm:$0x3]  ;;  %v275_v18 = vrot.slane %v274_v16, 1  ;;  %v281_v19 = vmax.f32 %v279_v15, %v280_v17  ;;  %v328_v40 = vsel %vm269_vm1, %v326_v35, 0.0  ;;  %v335_v43 = vsel %vm269_vm1, %v327_v39, 0.0 }
  0x42   : > { %v374_v13 = vadd.f32 %v567_v10, %v371_v9  ;;  %v329_v46 = vrot.slane %v328_v40, 4  ;;  %v336_v49 = vrot.slane %v335_v43, 4 }
  0x43   : > { %v276_v20 = vmax.f32 %v274_v16, %v275_v18  ;;  %v282_v21 = vrot.slane %v281_v19, 1  ;;  %v364_v16 = vld [vmem:[#allocation2] sm:$0x3] }
  0x44   : > { %375 = vst.msk [vmem:[#allocation3] sm:$0x3] %vm886_vm0, %v374_v13  ;;  %v330_v52 = vadd.f32 %v329_v46, %v328_v40  ;;  %v337_v54 = vadd.f32 %v336_v49, %v335_v43 }
  0x45   : > { %v283_v22 = vmax.f32 %v281_v19, %v282_v21 }
  0x46   : > { %v331_v55 = vrot.slane %v330_v52, 2  ;;  %v338_v56 = vrot.slane %v337_v54, 2 }
  0x47   : > { %v286_v23 = vcombine.low %v276_v20, %v283_v22 }
  0x48   : > { %v332_v57 = vadd.f32 %v331_v55, %v330_v52  ;;  %v339_v58 = vadd.f32 %v338_v56, %v337_v54 }
  0x49   : > { %v288_v24 = vsub.f32 %v264_v3, %v286_v23 }
  0x4a   : > { %v333_v59 = vrot.slane %v332_v57, 1  ;;  %v340_v60 = vrot.slane %v339_v58, 1 }
  0x4b   : > { %v289_v25 = vmul.f32 1.442695, %v288_v24  ;;  %v407_v19 = vld [vmem:[#allocation3] sm:$0x3] }
  0x4c   : > { %v334_v2 = vadd.f32 %v333_v59, %v332_v57  ;;  %v341_v7 = vadd.f32 %v340_v60, %v339_v58  ;;  %v416_v21 = vrot.slane %v407_v19, %v905_v28 }
  0x4d   : > { %639 = vpow2.f32 %v289_v25 }
  0x4e   : > { %v420_v4 = vsel %vm391_vm5, %v416_v21, 0.0 }
  0x5a   : > { %v640_v31 = vpop.eup %639 }
  0x5b   : > { %v292_v32 = vcombine.high %v640_v31, %v640_v31  ;;  %v294_v33 = vsel %vm269_vm1, %v640_v31, 0.0 }
  0x5c   : > { %v295_v34 = vrot.slane %v294_v33, 4 }
  0x5d   : > { %v301_v36 = vsel %vm269_vm1, %v292_v32, 0.0 }
  0x5e   : > { %v296_v37 = vadd.f32 %v295_v34, %v294_v33  ;;  %v302_v38 = vrot.slane %v301_v36, 4 }
  0x60   : > { %v297_v41 = vrot.slane %v296_v37, 2  ;;  %v303_v42 = vadd.f32 %v302_v38, %v301_v36 }
  0x62   : > { %v298_v44 = vadd.f32 %v297_v41, %v296_v37  ;;  %v304_v45 = vrot.slane %v303_v42, 2 }
  0x64   : > { %v299_v47 = vrot.slane %v298_v44, 1  ;;  %v305_v48 = vadd.f32 %v304_v45, %v303_v42 }
  0x66   : > { %v300_v50 = vadd.f32 %v299_v47, %v298_v44  ;;  %v306_v51 = vrot.slane %v305_v48, 1 }
  0x68   : > { %v307_v53 = vadd.f32 %v306_v51, %v305_v48  ;;  %641 = vlog2.f32 %v300_v50 }
  0x6a   : > { %643 = vlog2.f32 %v307_v53 }
  0x75   : > { %v642_v63 = vpop.eup %641 }
  0x76   : > { %v309_v0 = vmul.f32 0.6931472, %v642_v63 }
  0x77   : > { %v644_v3 = vpop.eup %643 }
  0x78   : > { %v311_v5 = vmul.f32 0.6931472, %v644_v3  ;;  %v312_v6 = vadd.f32 %v309_v0, %v276_v20  ;;  %v412_v20 = vrot.slane %v407_v19, %v903_v27 }
  0x7a   : > { %v313_v9 = vadd.f32 %v311_v5, %v283_v22  ;;  %v343_v10 = vsub.f32 %v312_v6, %v334_v2  ;;  %v419_v29 = vsel %vm391_vm5, %v412_v20, 0.0 }
  0x7b   : > { %v421_v31 = vadd.f32 %v420_v4, %v419_v29 }
  0x7c   : > { %v344_v11 = vsub.f32 %v313_v9, %v341_v7 }
  0x7e   : > { %v347_v13 = vcombine.low %v343_v10, %v344_v11 }
  0x80   : > { %v354_v14 = vrot.slane %v347_v13, %v353_v12 }
  0x82   : > { %v361_v15 = vrot.slane %v354_v14, %v353_v12 }
  0x84   : > { %v363_v17 = vsel %vm342_vm2, %v361_v15, 0.0 }
  0x85   : > { %v365_v18 = vadd.f32 %v364_v16, %v363_v17 }
  0x87   : > { %370 = vst.msk [vmem:[#allocation2] sm:$0x3] %vm886_vm0, %v365_v18 }
  0x8e   : > { %v379_v22 = vld [vmem:[#allocation2] sm:$0x3] }
  0x8f   : > { %v384_v23 = vrot.slane %v379_v22, %v903_v27  ;;  %v388_v24 = vrot.slane %v379_v22, %v905_v28 }
  0x91   : > { %v392_v25 = vsel %vm391_vm5, %v384_v23, 0.0  ;;  %v393_v26 = vsel %vm391_vm5, %v388_v24, 0.0 }
  0x92   : > { %v394_v30 = vadd.f32 %v393_v26, %v392_v25 }
  0x94   : > { %395 = vadd.xlane.f32.xlu0 %v394_v30 }
  0x98   : > { %422 = vadd.xlane.f32.xlu0 %v421_v31 }
 0x11d   : > { %v396_v1 = vpop.xlane.xlu0 %395 }
 0x11e   : > { %v397_v32 = vrot.slane %v396_v1, 4 }
 0x120   : > { %v398_v33 = vadd.f32 %v397_v32, %v396_v1 }
 0x121   : > { %v423_v34 = vpop.xlane.xlu0 %422 }
 0x122   : > { %v399_v35 = vrot.slane %v398_v33, 2  ;;  %v424_v36 = vrot.slane %v423_v34, 4 }
 0x124   : > { %v425_v37 = vadd.f32 %v424_v36, %v423_v34  ;;  %v400_v27 = vadd.f32 %v399_v35, %v398_v33 }
 0x126   : > { %v426_v38 = vrot.slane %v425_v37, 2  ;;  %v401_v28 = vrot.slane %v400_v27, 1 }
 0x128   : > { %v427_v39 = vadd.f32 %v426_v38, %v425_v37  ;;  %v402_v40 = vadd.f32 %v401_v28, %v400_v27 }
 0x12a   : > { %572 = vpush %v402_v40  ;;  %v428_v41 = vrot.slane %v427_v39, 1 }
 0x12c   : > { %v429_v42 = vadd.f32 %v428_v41, %v427_v39 }
 0x12e   : > { %574 = vpush %v429_v42 }
 0x15b   : > { %s573_s21 = spop %572 }
 0x15c   : > { %v404_v43 = vstv %s573_s21 }
 0x15d   : > { %406 = vst.msk [vmem:[%s250_s12] sm:$0x1] %vm405_vm6, %v404_v43 }
 0x15f   : > { %s575_s28 = spop %574 }
 0x160   : > { %v431_v44 = vstv %s575_s28 }
 0x161   : > { %432 = vst.msk [vmem:[%s253_s27] sm:$0x1] %vm405_vm6, %v431_v44 }
 0x162 PF: > { %s20_s17 = sadd.s32 1, %s755_s17   ;;  %s959_s12 = smov %s739_s13 }
 0x163   : > { %p17_p9 = scmp.ge.s32.totalorder %s20_s17, 4   ;;  %s960_s13 = smov %s743_s14 }
 0x164   : > { %s961_s14 = smov %s830_s24  ;;  %s962_s15 = smov %s751_s16 }
 0x165   : > { %s963_s16 = smov %s965_s19  ;;  %19 = sbr.rel (!%p17_p9) target bundleno = 6 (0x6), region = 101 }
 0x16a   :  { %462 = vsyncpa [#allocation5], 1 }
 0x16b   :  { %464 = vsyncpa [#allocation5 + $0x1], 1 }
 0x16c   :  { %465 = vsyncpa [#allocation7], 1 }
 0x16d   :  { %467 = vsyncpa [#allocation7 + $0x1], 1 }

</bundles_post_ra>
